<compile_context>
chip_gen: v7x
topology: tpu7x:2x2x1
jax: 0.10.0
libtpu: 0.0.40
codegen_flags: <defaults>
</compile_context>

<pallas_src>
import math

import jax
import jax.numpy as jnp
from jax.experimental import pallas as pl
from jax.experimental.pallas import tpu as pltpu


# ---------------------------------------------------------------------------
# PE table (built once, cached by the caller -- equivalent of register_buffer)
# ---------------------------------------------------------------------------
def make_positional_encoding_table(feature_size: int, max_len: int = 5000) -> jnp.ndarray:
    """Sinusoidal table, shape (max_len, 1, feature_size), float32 (pre-shaped for broadcast)."""
    if feature_size % 2 != 0:
        # Same restriction as the reference PyTorch implementation (pe[:,1::2] sizing).
        raise ValueError(f"feature_size must be even, got {feature_size}")
    position = jnp.arange(0, max_len, dtype=jnp.float32)[:, None]            # (max_len, 1)
    div_term = jnp.exp(
        jnp.arange(0, feature_size, 2, dtype=jnp.float32)
        * (-math.log(10000.0) / feature_size)
    )                                                                         # (F//2,)
    args = position * div_term                                                # (max_len, F//2)
    pe = jnp.zeros((max_len, feature_size), dtype=jnp.float32)
    pe = pe.at[:, 0::2].set(jnp.sin(args))
    pe = pe.at[:, 1::2].set(jnp.cos(args))
    return pe[:, None, :]                                                     # (max_len, 1, F)


# ---------------------------------------------------------------------------
# Kernel
# ---------------------------------------------------------------------------
def _pe_add_kernel(x_ref, pe_ref, o_ref):
    # x_ref : (tS, tB, F) tile in x.dtype
    # pe_ref: (tS, 1,  F) tile in float32 -- broadcasts over the batch axis.
    # Add in f32 (matches fp32-pe PyTorch math), cast once on store.
    o_ref[...] = (x_ref[...].astype(jnp.float32) + pe_ref[...]).astype(o_ref.dtype)


# ---------------------------------------------------------------------------
# Tiling: budget by PADDED VMEM footprint of the whole resident set
# ---------------------------------------------------------------------------
_VMEM_RESIDENT_BUDGET = 16 * 1024 * 1024   # padded bytes for all pipelined tiles
_VMEM_LIMIT_BYTES = 32 * 1024 * 1024       # safe on v5e/v6e (128 MiB) and v7x (64 MiB)


def _cdiv(a: int, b: int) -> int:
    return (a + b - 1) // b


def _round_up(x: int, m: int) -> int:
    return ((x + m - 1) // m) * m


def _sublane_multiple(itemsize: int) -> int:
    # 32-bit: 8 sublanes; 16-bit packs 2/sublane -> 16; 8-bit -> 32.
    return 8 * max(1, 4 // itemsize)


def _choose_tiles(S: int, B: int, F: int, x_itemsize: int):
    """Pick (tS, tB) so the double-buffered x + out + pe tiles fit the VMEM budget."""
    sub_x = _sublane_multiple(x_itemsize)
    sub_pe = _sublane_multiple(4)          # pe is float32
    lane_F = _round_up(F, 128)

    def footprint(tS: int, tB: int) -> int:
        padded_tB = _round_up(tB, sub_x)
        x_tile = tS * padded_tB * lane_F * x_itemsize
        pe_tile = tS * sub_pe * lane_F * 4
        # x, out and pe are each double-buffered by the pipeline.
        return 2 * x_tile + 2 * x_tile + 2 * pe_tile

    if footprint(1, B) <= _VMEM_RESIDENT_BUDGET:
        # Preferred path: full-batch tiles, as many seq rows as the budget allows.
        tB = B
        tS = max(1, _VMEM_RESIDENT_BUDGET // footprint(1, B))
        if tS >= 8:
            tS = (tS // 8) * 8
        tS = min(S, tS)
        # Keep >= 2 grid steps along seq when S allows, so v7x's two TCs both get work.
        tS = min(tS, max(1, _round_up(_cdiv(S, 2), 8)))
    else:
        # One (B, F) plane alone exceeds the budget: tile the batch axis instead.
        tS = 1
        per_group = footprint(1, sub_x)
        n_groups = max(1, _VMEM_RESIDENT_BUDGET // per_group)
        tB = min(B, n_groups * sub_x)
    return tS, tB


# ---------------------------------------------------------------------------
# Forward
# ---------------------------------------------------------------------------
def positional_encoding_forward(x: jnp.ndarray, pe_table: jnp.ndarray,
                                *, donate_x: bool = False) -> jnp.ndarray:
    """x: (seq_len, batch, feature); pe_table: cached (max_len, 1, feature) float32."""
    S, B, F = x.shape
    max_len = pe_table.shape[0]
    if S > max_len:
        raise ValueError(f"seq_len {S} exceeds max_len {max_len} of pe table")
    if F != pe_table.shape[2]:
        raise ValueError(f"feature dim mismatch: x has {F}, pe table has {pe_table.shape[2]}")

    tS, tB = _choose_tiles(S, B, F, jnp.dtype(x.dtype).itemsize)
    grid = (_cdiv(S, tS), _cdiv(B, tB))

    # NOTE: for very small batch (B < 8 f32 / < 16 bf16) a flattened (S*B, F) layout
    # would use vregs/DMA more densely; kept as 3-D here to mirror the module layout.
    return pl.pallas_call(
        _pe_add_kernel,
        out_shape=jax.ShapeDtypeStruct((S, B, F), x.dtype),
        grid=grid,
        in_specs=[
            pl.BlockSpec((tS, tB, F), lambda i, j: (i, j, 0)),
            pl.BlockSpec((tS, 1, F), lambda i, j: (i, 0, 0)),   # windows pe[:S] for free
        ],
        out_specs=pl.BlockSpec((tS, tB, F), lambda i, j: (i, j, 0)),
        compiler_params=pltpu.CompilerParams(
            dimension_semantics=("parallel", "parallel"),  # independent tiles -> megacore
            vmem_limit_bytes=_VMEM_LIMIT_BYTES,
        ),
        input_output_aliases=({0: 0} if donate_x else {}),
    )(x, pe_table)


# ---------------------------------------------------------------------------
# Demo / self-check
# ---------------------------------------------------------------------------
if __name__ == "__main__":
    key = jax.random.PRNGKey(0)

    # Small, lane-dense demo shapes (feature is a multiple of 128).
    seq_len, batch, feature = 16, 2, 128
    max_len = 64

    # Built once and cached, like the PyTorch register_buffer.
    pe_table = make_positional_encoding_table(feature, max_len=max_len)  # (max_len, 1, F) f32

    x = jax.random.normal(key, (seq_len, batch, feature), dtype=jnp.float32)
    out = jax.block_until_ready(positional_encoding_forward(x, pe_table))

    ref = x + pe_table[:seq_len]
    assert out.shape == (seq_len, batch, feature)
    assert out.dtype == x.dtype
    assert jnp.allclose(out, ref, atol=1e-6), "f32 mismatch vs reference"

    # bf16 path: pe stays f32 in HBM, add in f32 in-kernel, single round on store.
    x_bf16 = x.astype(jnp.bfloat16)
    out_bf16 = jax.block_until_ready(positional_encoding_forward(x_bf16, pe_table))
    ref_bf16 = (x_bf16.astype(jnp.float32) + pe_table[:seq_len]).astype(jnp.bfloat16)
    assert out_bf16.dtype == jnp.bfloat16
    assert jnp.allclose(out_bf16.astype(jnp.float32), ref_bf16.astype(jnp.float32),
                        atol=1e-2), "bf16 mismatch vs reference"

    # Exercise the donate-x path once as well.
    out_donated = jax.block_until_ready(
        positional_encoding_forward(x + 0.0, pe_table, donate_x=True))
    assert jnp.allclose(out_donated, ref, atol=1e-6), "donated-x mismatch vs reference"

    print("KERNEL_OK")
</pallas_src>

<mosaic_0001>
module attributes {stable_mosaic.version = 11 : i64} {
  func.func @_pe_add_kernel(%arg0: i32, %arg1: i32, %arg2: memref<8x2x128xf32, #tpu.memory_space<vmem>>, %arg3: memref<8x1x128xf32, #tpu.memory_space<vmem>>, %arg4: memref<8x2x128xf32, #tpu.memory_space<vmem>>) attributes {dimension_semantics = [#tpu.dimension_semantics<parallel>, #tpu.dimension_semantics<parallel>], iteration_bounds = array<i64: 2, 1>, scalar_prefetch = 0 : i64, scratch_operands = 0 : i64, tpu.core_type = #tpu.core_type<tc>, window_params = [{transform_indices = @transform_0, window_bounds = array<i64: 8, 2, 128>}, {transform_indices = @transform_1, window_bounds = array<i64: 8, 1, 128>}, {transform_indices = @transform_2, window_bounds = array<i64: 8, 2, 128>}]} {
    %c0 = arith.constant 0 : index
    %c0_0 = arith.constant 0 : index
    %c0_1 = arith.constant 0 : index
    %0 = vector.load %arg2[%c0, %c0_0, %c0_1] : memref<8x2x128xf32, #tpu.memory_space<vmem>>, vector<8x2x128xf32>
    %c0_2 = arith.constant 0 : index
    %c0_3 = arith.constant 0 : index
    %c0_4 = arith.constant 0 : index
    %1 = vector.load %arg3[%c0_2, %c0_3, %c0_4] : memref<8x1x128xf32, #tpu.memory_space<vmem>>, vector<8x1x128xf32>
    %2 = vector.broadcast %1 : vector<8x1x128xf32> to vector<8x2x128xf32>
    %3 = arith.addf %0, %2 : vector<8x2x128xf32>
    %c0_5 = arith.constant 0 : index
    %c0_6 = arith.constant 0 : index
    %c0_7 = arith.constant 0 : index
    %4 = vector.load %arg4[%c0_5, %c0_6, %c0_7] : memref<8x2x128xf32, #tpu.memory_space<vmem>>, vector<8x2x128xf32>
    tpu.vector_store %arg4[%c0_5, %c0_6, %c0_7], %3 {strides = array<i32>} : memref<8x2x128xf32, #tpu.memory_space<vmem>>, vector<8x2x128xf32>,
    return
  }
  func.func @transform_0(%arg0: i32, %arg1: i32) -> (i32, i32, i32) {
    %c0_i32 = arith.constant 0 : i32
    %c0_i32_0 = arith.constant 0 : i32
    return %arg0, %arg1, %c0_i32 : i32, i32, i32
  }
  func.func @transform_1(%arg0: i32, %arg1: i32) -> (i32, i32, i32) {
    %c0_i32 = arith.constant 0 : i32
    %c0_i32_0 = arith.constant 0 : i32
    %c0_i32_1 = arith.constant 0 : i32
    return %arg0, %c0_i32, %c0_i32_0 : i32, i32, i32
  }
  func.func @transform_2(%arg0: i32, %arg1: i32) -> (i32, i32, i32) {
    %c0_i32 = arith.constant 0 : i32
    %c0_i32_0 = arith.constant 0 : i32
    return %arg0, %arg1, %c0_i32 : i32, i32, i32
  }
}

</mosaic_0001>

<bundles_post_ra>
// kernel: tpu_custom_call.1
= control target key start
LH: loop header
LB: loop body
LE: loop exit
PB: predicated region body
PF: predicated region fallthrough
CT: control target
= control target key end

     0   :  { %7 = vsyncpa [#allocation3], 0  ;;  %s958_s0 = inlined_call_operand.hbm [shape: f32[16,2,128], index: 0, kind: input, shape index: {}]   ;;  %s959_s1 = inlined_call_operand.hbm [shape: f32[64,1,128], index: 1, kind: input, shape index: {}]   ;;  %s960_s2 = inlined_call_operand.hbm [shape: f32[16,2,128], index: 2, kind: output, shape index: {}]  }
   0x1   :  { %9 = vsyncpa [#allocation3 + $0x1], 0 }
   0x2   :  { %10 = vsyncpa [#allocation6], 0 }
   0x3   :  { %12 = vsyncpa [#allocation6 + $0x1], 0 }
   0x4   :  { %13 = vsyncpa [#allocation4], 0 }
   0x5   :  { %15 = vsyncpa [#allocation4 + $0x1], 0  ;;  %s700_s9 = smov 0   ;;  %s702_s10 = smov 0  }
   0x6   :  { %s704_s11 = smov 0   ;;  %s706_s12 = smov 0  }
   0x7   :  { %s708_s13 = smov 0   ;;  %s710_s14 = smov 0  }
   0x8 LB: > { %s425_s15 = sadd.s32 4294967295, %s674_s14   ;;  %s426_s16 = sadd.s32 4294967294, %s674_s14   ;;  %s674_s14 = sphi %s710_s14, %s21_s14   ;;  %s670_s13 = sphi %s708_s13, %s978_s13   ;;  %s666_s12 = sphi %s706_s12, %s977_s12   ;;  %s662_s11 = sphi %s704_s11, %s976_s11   ;;  %s658_s10 = sphi %s702_s10, %s975_s10   ;;  %s654_s9 = sphi %s700_s9, %s974_s9  }
   0x9   : > { %s33_s17 = sadd.s32 1, %s670_s13  ;;  %s42_s18 = sadd.s32 1, %s662_s11 }
   0xa   : > { %p35_p0 = scmp.ge.s32.totalorder %s33_s17, 2  ;;  %p49_p1 = scmp.ne.s32.totalorder %s662_s11, %s658_s10 }
   0xb   : > { %p50_p2 = scmp.eq.s32.totalorder %s674_s14, 0  ;;  %p55_p3 = scmp.ne.s32.totalorder %s658_s10, %s654_s9 }
   0xc   : > { %s980_s17 = smov (%p35_p0, %s33_s17), 0  ;;  %p56_p5 = scmp.eq.s32.totalorder %s425_s15, 0 }
   0xd   : > { %p741_p4 = por %p50_p2, %p49_p1  ;;  %s37_s20 = ssub.s32 %s670_s13, %s980_s17 }
   0xe   : > { %p107_p6 = scmp.eq.s32.totalorder %s425_s15, 1  ;;  %p40_p7 = scmp.eq.s32.totalorder %s37_s20, 0 }
   0xf   : > { %p747_p8 = por %p56_p5, %p55_p3  ;;  %p113_p10 = scmp.eq.s32.totalorder %s426_s16, 1 }
  0x10   : > { %p751_p9 = por %p107_p6, %p49_p1  ;;  %p472_p13 = scmp.lt.s32.totalorder %s674_s14, 2 }
  0x11   : > { %s964_s21 = scalar_select %p747_p8, 1, 0 }
  0x12   : > { %s965_s22 = scalar_select %p751_p9, 1, 0 }
  0x13   : > { %s756_s23 = scalar_select %p40_p7, %s662_s11, %s42_s18  }
  0x14   : > { %p758_p11 = por %p113_p10, %p55_p3  ;;  %s765_s25 = sand.u32 1, %s662_s11  }
  0x15   : > { %s429_s26 = sshll.u32 %s765_s25, 4  ;;  %s452_s27 = sshll.u32 %s670_s13, 8 }
  0x16   : > { %s966_s24 = scalar_select %p758_p11, 1, 0 }
  0x17   : > { %s772_s30 = scalar_lea.hbm %s958_s0, %s452_s27  ;;  %s137_s3 = scalar_lea.vmem [#allocation2], %s429_s26 }
  0x18   : > { %s145_s4 = sshll.u32 %s137_s3, 4  ;;  %p778_p0 = pnand %p472_p13, %p741_p4  ;;  %s774_s4 = int_to_ptr.vmem [resolvable:$true] %s145_s4 }
  0x19   : > { %s134_s6 = scalar_lea.sflag [#allocation3], %s765_s25  ;;  %s528_s7 = scalar_lea.hbm %s772_s30, 256 }
  0x1a   : > { %p529_p2 = scmp.ne.s32.totalorder %s772_s30, %s528_s7  ;;  %p530_p3 = pneg %p778_p0 }
  0x1b   : > { %s533_s16 = scalar_lea.hbm %s958_s0, 512  ;;  %p534_p4 = scmp.lt.u32.totalorder %s772_s30, %s958_s0 }
  0x1c   : > { %p531_p5 = pnand %p530_p3, %p529_p2  ;;  %p535_p7 = scmp.lt.u32.totalorder %s533_s16, %s528_s7 }
  0x1d   : > { %p537_p13 = scmp.lt.u32.totalorder %s528_s7, %s772_s30 }
  0x1e   : > { %p532_p6 = pneg %p531_p5  ;;  %p536_p10 = por %p535_p7, %p534_p4 }
  0x20   : > { %p538_p12 = por %p537_p13, %p536_p10 }
  0x22   : > { %p539_p1 = pnand %p538_p12, %p532_p6 }
  0x24   : > { %542 = shalt.err (!%p539_p1)
}
  0x25   : > { %s543_s20 = scalar_lea.vmem %s774_s4, 256  ;;  %s676_s26 = smov [#allocation2]  }
  0x26   : > { %p544_p2 = scmp.ne.s32.totalorder %s774_s4, %s543_s20  ;;  %s548_s27 = sshll.u32 %s676_s26, 4  ;;  %s549_s27 = int_to_ptr.vmem [resolvable:$false] %s548_s27 }
  0x27   : > { %s550_s28 = scalar_lea.vmem %s549_s27, 512  ;;  %p551_p9 = scmp.lt.s32.totalorder %s774_s4, %s549_s27 }
  0x28   : > { %p546_p5 = pnand %p544_p2, %p530_p3  ;;  %p552_p4 = scmp.lt.s32.totalorder %s550_s28, %s543_s20 }
  0x2a   : > { %p547_p11 = pneg %p546_p5  ;;  %p553_p7 = por %p552_p4, %p551_p9 }
  0x2c   : > { %p554_p10 = pnand %p553_p7, %p547_p11 }
  0x2e   : > { %557 = shalt.err (!%p554_p10)
}
  0x2f   : > { %s677_s29 = smov 32   ;;  %s678_s3 = smov 2  }
  0x30   : > { %464 = dma.hbm_to_vmem [thread:$0]  (!%p778_p0), %s772_s30, 256, %s774_s4, %s134_s6, %s677_s29, %s677_s29, %s678_s3  }
  0x31   : > { %p174_p12 = scmp.lt.s32.totalorder %s674_s14, 3  ;;  %s432_s7 = sshll.u32 %s765_s25, 3 }
  0x32   : > { %s453_s8 = sshll.u32 %s670_s13, 7  ;;  %p968_p9 = scmp.ge.s32.totalorder %s674_s14, 1 }
  0x33   : > { %s823_s19 = scalar_lea.hbm %s959_s1, %s453_s8  ;;  %s159_s20 = scalar_lea.vmem [#allocation5], %s432_s7 }
  0x34   : > { %p816_p11 = pnand %p968_p9, %p174_p12  ;;  %s166_s26 = sshll.u32 %s159_s20, 4  ;;  %s825_s26 = int_to_ptr.vmem [resolvable:$true] %s166_s26 }
  0x35   : > { %s156_s30 = scalar_lea.sflag [#allocation6], %s765_s25  ;;  %s558_s4 = scalar_lea.hbm %s823_s19, 128 }
  0x36   : > { %p559_p1 = scmp.ne.s32.totalorder %s823_s19, %s558_s4  ;;  %s563_s28 = scalar_lea.hbm %s959_s1, 1024 }
  0x37   : > { %p564_p2 = scmp.lt.u32.totalorder %s823_s19, %s959_s1  ;;  %p565_p5 = scmp.lt.u32.totalorder %s563_s28, %s558_s4 }
  0x38   : > { %p561_p6 = pnand %p559_p1, %p530_p3  ;;  %p567_p7 = scmp.lt.u32.totalorder %s558_s4, %s823_s19 }
  0x39   : > { %p566_p4 = por %p565_p5, %p564_p2 }
  0x3a   : > { %p562_p13 = pneg %p561_p6 }
  0x3b   : > { %p568_p10 = por %p567_p7, %p566_p4 }
  0x3d   : > { %p569_p12 = pnand %p568_p10, %p562_p13 }
  0x3f   : > { %572 = shalt.err (!%p569_p12)
}
  0x40   : > { %s573_s7 = scalar_lea.vmem %s825_s26, 128  ;;  %s679_s8 = smov [#allocation5]  }
  0x41   : > { %p574_p9 = scmp.ne.s32.totalorder %s825_s26, %s573_s7  ;;  %s578_s16 = sshll.u32 %s679_s8, 4  ;;  %s579_s16 = int_to_ptr.vmem [resolvable:$false] %s578_s16 }
  0x42   : > { %s580_s18 = scalar_lea.vmem %s579_s16, 256  ;;  %p581_p8 = scmp.lt.s32.totalorder %s825_s26, %s579_s16 }
  0x43   : > { %p576_p1 = pnand %p574_p9, %p530_p3  ;;  %p582_p2 = scmp.lt.s32.totalorder %s580_s18, %s573_s7 }
  0x45   : > { %p577_p6 = pneg %p576_p1  ;;  %p583_p5 = por %p582_p2, %p581_p8 }
  0x47   : > { %p584_p4 = pnand %p583_p5, %p577_p6 }
  0x49   : > { %587 = shalt.err (!%p584_p4)
}
  0x4a   : > { %s680_s20 = smov 16   ;;  %s681_s4 = smov 1  }
  0x4b   : > { %467 = dma.hbm_to_vmem [thread:$0]  (!%p778_p0), %s823_s19, 128, %s825_s26, %s156_s30, %s680_s20, %s680_s20, %s681_s4  }
  0x4c   : > { %178 = sbr.rel (%p816_p11) target bundleno = 119 (0x77), region = 28  ;;  %s856_s6 = sand.u32 (!%p816_p11), 1, %s658_s10  }
  0x4d   : > { %s436_s27 = sshll.u32 (!%p816_p11), %s856_s6, 4  ;;  %s181_s28 = scalar_lea.sflag (!%p816_p11), [#allocation3], %s856_s6 }
  0x4e   : > { %s860_s29 = scalar_lea.vmem (!%p816_p11), [#allocation2], %s436_s27  ;;  %p970_p8 = scmp.ne.s32.totalorder (!%p816_p11), %s964_s21, 0 }
  0x53   : > { %641 = dma.done.wait (%p970_p8), %s181_s28, 256  }
  0x54   : > { %643 = vsyncadd (%p970_p8), %s181_s28, 4294967040  ;;  %s437_s25 = sshll.u32 %s856_s6, 3  ;;  %s190_s5 = scalar_lea.sflag [#allocation6], %s856_s6 }
  0x55   : > { %s868_s15 = scalar_lea.vmem [#allocation5], %s437_s25 }
  0x56   : > { %645 = dma.done.wait (%p970_p8), %s190_s5, 128  }
  0x57   : > { %647 = vsyncadd (%p970_p8), %s190_s5, 4294967168  ;;  %s874_s19 = scalar_lea.vmem [#allocation7], %s436_s27  ;;  %s454_s30 = sshll.u32 %s666_s12, 8  ;;  %v222_v0 = vld [vmem:[%s860_s29] sm:$0x3] }
  0x58   : > { %s317_s26 = sshll.u32 %s874_s19, 4  ;;  %v439_v1 = vld [vmem:[%s868_s15] ss:$0 sm:$0xff]  ;;  %v223_v2 = vld [vmem:[%s860_s29 + $0x2] sm:$0x3]  ;;  %s905_s7 = scalar_lea.hbm %s960_s2, %s454_s30  ;;  %s896_s26 = int_to_ptr.vmem [resolvable:$true] %s317_s26 }
  0x59   : > { %v286_v3 = vadd.f32 %v439_v1, %v222_v0  ;;  %v440_v4 = vld [vmem:[%s868_s15 + $0x1] ss:$0 sm:$0xff]  ;;  %v224_v5 = vld [vmem:[%s860_s29 + $0x4] sm:$0x3]  ;;  %v441_v6 = vld [vmem:[%s868_s15 + $0x2] ss:$0 sm:$0xff] }
  0x5a   : > { %v287_v7 = vadd.f32 %v440_v4, %v223_v2  ;;  %v288_v8 = vadd.f32 %v441_v6, %v224_v5  ;;  %v225_v9 = vld [vmem:[%s860_s29 + $0x6] sm:$0x3]  ;;  %v442_v10 = vld [vmem:[%s868_s15 + $0x3] ss:$0 sm:$0xff]  ;;  %v226_v11 = vld [vmem:[%s860_s29 + $0x8] sm:$0x3] }
  0x5b   : > { %294 = vst [vmem:[%s874_s19] sm:$0x3] %v286_v3  ;;  %v289_v12 = vadd.f32 %v442_v10, %v225_v9  ;;  %v443_v13 = vld [vmem:[%s868_s15 + $0x4] ss:$0 sm:$0xff]  ;;  %v227_v14 = vld [vmem:[%s860_s29 + $0xa] sm:$0x3]  ;;  %s303_s8 = scalar_lea.sflag [#allocation4], %s856_s6 }
  0x5c   : > { %v444_v15 = vld [vmem:[%s868_s15 + $0x5] ss:$0 sm:$0xff]  ;;  %295 = vst [vmem:[%s874_s19 + $0x2] sm:$0x3] %v287_v7  ;;  %296 = vst [vmem:[%s874_s19 + $0x4] sm:$0x3] %v288_v8  ;;  %v290_v16 = vadd.f32 %v443_v13, %v226_v11 }
  0x5d   : > { %v291_v17 = vadd.f32 %v444_v15, %v227_v14  ;;  %v228_v18 = vld [vmem:[%s860_s29 + $0xc] sm:$0x3]  ;;  %v445_v19 = vld [vmem:[%s868_s15 + $0x6] ss:$0 sm:$0xff]  ;;  %v229_v20 = vld [vmem:[%s860_s29 + $0xe] sm:$0x3] }
  0x5e   : > { %297 = vst [vmem:[%s874_s19 + $0x6] sm:$0x3] %v289_v12  ;;  %v292_v21 = vadd.f32 %v445_v19, %v228_v18  ;;  %v446_v22 = vld [vmem:[%s868_s15 + $0x7] ss:$0 sm:$0xff]  ;;  %298 = vst [vmem:[%s874_s19 + $0x8] sm:$0x3] %v290_v16 }
  0x5f   : > { %299 = vst [vmem:[%s874_s19 + $0xa] sm:$0x3] %v291_v17  ;;  %v293_v23 = vadd.f32 %v446_v22, %v229_v20  ;;  %s588_s16 = scalar_lea.vmem %s896_s26, 256  ;;  %p971_p3 = scmp.ne.s32.totalorder %s965_s22, 0 }
  0x60   : > { %300 = vst [vmem:[%s874_s19 + $0xc] sm:$0x3] %v292_v21  ;;  %p589_p0 = scmp.ne.s32.totalorder %s896_s26, %s588_s16  ;;  %s682_s18 = smov [#allocation7]  }
  0x61   : > { %301 = vst [vmem:[%s874_s19 + $0xe] sm:$0x3] %v293_v23  ;;  %s592_s20 = sshll.u32 %s682_s18, 4  ;;  %s593_s20 = int_to_ptr.vmem [resolvable:$false] %s592_s20 }
  0x62   : > { %p590_p11 = pnand %p589_p0, %p971_p3  ;;  %s594_s12 = scalar_lea.vmem %s593_s20, 512 }
  0x63   : > { %p595_p7 = scmp.lt.s32.totalorder %s896_s26, %s593_s20  ;;  %p596_p10 = scmp.lt.s32.totalorder %s594_s12, %s588_s16 }
  0x64   : > { %p591_p13 = pneg %p590_p11 }
  0x65   : > { %p597_p12 = por %p596_p10, %p595_p7 }
  0x67   : > { %p598_p9 = pnand %p597_p12, %p591_p13 }
  0x69   : > { %601 = shalt.err (!%p598_p9)
}
  0x6a   : > { %s602_s4 = scalar_lea.hbm %s905_s7, 256  ;;  %s606_s29 = scalar_lea.hbm %s960_s2, 512 }
  0x6b   : > { %p603_p1 = scmp.ne.s32.totalorder %s905_s7, %s602_s4  ;;  %p607_p5 = scmp.lt.u32.totalorder %s905_s7, %s960_s2 }
  0x6c   : > { %p608_p4 = scmp.lt.u32.totalorder %s606_s29, %s602_s4  ;;  %p610_p0 = scmp.lt.u32.totalorder %s602_s4, %s905_s7 }
  0x6d   : > { %p604_p6 = pnand %p603_p1, %p971_p3 }
  0x6e   : > { %p609_p8 = por %p608_p4, %p607_p5 }
  0x6f   : > { %p605_p2 = pneg %p604_p6 }
  0x70   : > { %p611_p11 = por %p610_p0, %p609_p8 }
  0x72   : > { %p612_p13 = pnand %p611_p11, %p605_p2 }
  0x74   : > { %615 = shalt.err (!%p612_p13)
}
  0x75   : > { %s683_s15 = smov 32   ;;  %s684_s19 = smov 2  }
  0x76   : > { %459 = dma.vmem_to_hbm [thread:$0]  (%p971_p3), %s896_s26, 256, %s905_s7, %s303_s8, %s683_s15, %s683_s15, %s684_s19  }
  0x77 PF: > { %s332_s30 = sand.u32 1, %s654_s9   ;;  %p972_p7 = scmp.ne.s32.totalorder %s966_s24, 0 }
  0x78   : > { %p973_p10 = scmp.ge.s32.totalorder %s674_s14, 2  ;;  %s333_s21 = scalar_lea.sflag [#allocation4], %s332_s30 }
  0x7a   : > { %p469_p12 = pnand %p973_p10, %p972_p7 }
  0x7c   : > { %649 = dma.done.wait (!%p469_p12), %s333_s21, 256  }
  0x7d   : > { %651 = vsyncadd (!%p469_p12), %s333_s21, 4294967040  ;;  %s21_s14 = sadd.s32 1, %s674_s14   ;;  %s974_s9 = smov %s658_s10 }
  0x7e   : > { %p18_p9 = scmp.ge.s32.totalorder %s21_s14, 4   ;;  %s975_s10 = smov %s662_s11 }
  0x7f   : > { %s976_s11 = smov %s756_s23  ;;  %s977_s12 = smov %s670_s13 }
  0x80   : > { %s978_s13 = smov %s980_s17  ;;  %20 = sbr.rel (!%p18_p9) target bundleno = 8 (0x8), region = 86 }
  0x87   :  { %338 = vsyncpa [#allocation3], 1 }
  0x88   :  { %340 = vsyncpa [#allocation3 + $0x1], 1 }
  0x89   :  { %341 = vsyncpa [#allocation6], 1 }
  0x8a   :  { %343 = vsyncpa [#allocation6 + $0x1], 1 }
  0x8b   :  { %344 = vsyncpa [#allocation4], 1 }
  0x8c   :  { %346 = vsyncpa [#allocation4 + $0x1], 1 }

</bundles_post_ra>
